<compile_context>
chip_gen: v6e
topology: v6e:2x2x1
jax: 0.10.0
libtpu: 0.0.40
codegen_flags: <defaults>
</compile_context>

<pallas_src>
import jax
import jax.numpy as jnp
from jax.experimental import pallas as pl
from jax.experimental.pallas import tpu as pltpu


W0 = 30.0  # SIREN frequency factor


def _sine_kernel(x_ref, o_ref):
    # Hot path: elementwise sin(30 * x) on the current VMEM tile (VPU).
    # Upcast once per tile: v5e has no bf16 VPU path, and f32 range reduction
    # for the 30*x argument is more accurate on all chips.
    x = x_ref[...].astype(jnp.float32)
    o_ref[...] = jnp.sin(W0 * x).astype(o_ref.dtype)


def _target_tile_bytes() -> int:
    """Per-buffer tile byte target, keyed on chip generation."""
    try:
        kind = jax.devices()[0].device_kind.lower()
    except Exception:  # pragma: no cover - defensive; default is safe anywhere
        kind = ""
    if ("v6" in kind) or ("v7" in kind) or ("7x" in kind) or ("v5p" in kind):
        # Fast HBM + roomy scoped VMEM: bigger tiles amortize per-step overhead.
        return 6 << 20
    # v5e and older: 16 MiB scoped-VMEM default; 2 MiB tiles are already <10%
    # per-step overhead at ~0.82 TB/s.
    return 2 << 20


def _choose_lanes(n: int) -> int:
    """Widest lane dim (multiple of 128) that evenly divides n."""
    for lanes in (4096, 2048, 1024, 512, 256, 128):
        if n % lanes == 0:
            return lanes
    return 128


def _choose_tile_rows(rows: int, row_bytes: int, target_bytes: int) -> int:
    """Row-tile size: multiple of 8 (or full extent), ~target bytes per buffer,
    and >= 2 roughly balanced grid steps when possible (v7x has 2 TCs)."""
    if rows <= 8:
        return rows  # single tiny block, full extent (no parallelism to be had)
    by_bytes = max(8, (target_bytes // max(1, row_bytes)) // 8 * 8)
    steps = max(2, pl.cdiv(rows, by_bytes))
    if steps % 2:
        steps += 1  # even step count avoids a 1-step imbalance across 2 TCs
    return max(8, min(by_bytes, pl.cdiv(pl.cdiv(rows, steps), 8) * 8))


def sine(x: jax.Array, *, donate: bool = False) -> jax.Array:
    """Apply sin(30*x) elementwise via a Pallas TPU kernel. Any shape/dtype.

    If `donate=True` (and the dtype is preserved), the input HBM buffer is
    aliased to the output to avoid allocating a second full-size buffer.
    """
    orig_shape = x.shape
    in_dtype = x.dtype
    # Match torch.sin promotion: integer/bool inputs produce float output.
    out_dtype = in_dtype if jnp.issubdtype(in_dtype, jnp.floating) else jnp.float32
    n = x.size
    if n == 0:
        return jnp.zeros(orig_shape, out_dtype)

    in_item = jnp.dtype(in_dtype).itemsize
    out_item = jnp.dtype(out_dtype).itemsize
    itemsize = max(in_item, out_item)
    target_bytes = _target_tile_bytes()

    if n % 128 == 0:
        # Common case: lane-dense slab, widest lane width that divides n.
        lanes = _choose_lanes(n)
        rows = n // lanes
    else:
        # Ragged case: keep the array's own trailing dim as a full-extent lane
        # block (allowed regardless of 128-divisibility) -> no pad, no slice.
        lanes = orig_shape[-1] if x.ndim >= 1 else 1
        rows = n // lanes

    padded_lanes = pl.cdiv(lanes, 128) * 128
    tile_rows = _choose_tile_rows(rows, padded_lanes * itemsize, target_bytes)
    padded_rows = pl.cdiv(tile_rows, 8) * 8
    tile_vmem_bytes = padded_rows * padded_lanes * itemsize
    buffered_bytes = 4 * tile_vmem_bytes + (8 << 20)  # 2 in + 2 out bufs + slack

    if buffered_bytes > (48 << 20):
        # TODO(synk): extremely large ragged trailing dims (> ~300K elements)
        # would overflow double-buffered VMEM even at 8 rows; a single fused
        # XLA elementwise op is already at the HBM roofline for this edge case.
        return jnp.sin(W0 * x.astype(jnp.float32)).astype(out_dtype)

    slab = x.reshape(rows, lanes)  # free reshape (contiguous collapse)
    grid = (pl.cdiv(rows, tile_rows),)  # partial last block clipped by Pallas

    cost = pl.CostEstimate(
        flops=n,                                  # one multiply per element
        transcendentals=n,                        # one sin per element
        bytes_accessed=n * (in_item + out_item),  # exactly one read + one write
    )

    io_aliases = {0: 0} if (donate and in_dtype == out_dtype) else {}

    out = pl.pallas_call(
        _sine_kernel,
        out_shape=jax.ShapeDtypeStruct((rows, lanes), out_dtype),
        grid_spec=pltpu.PrefetchScalarGridSpec(
            num_scalar_prefetch=0,
            grid=grid,
            in_specs=[pl.BlockSpec((tile_rows, lanes), lambda i: (i, 0))],
            out_specs=pl.BlockSpec((tile_rows, lanes), lambda i: (i, 0)),
        ),
        compiler_params=pltpu.CompilerParams(
            dimension_semantics=("parallel",),
            vmem_limit_bytes=int(max(16 << 20, min(64 << 20, buffered_bytes))),
        ),
        cost_estimate=cost,
        input_output_aliases=io_aliases,
    )(slab)

    return out.reshape(orig_shape)


if __name__ == "__main__":
    key = jax.random.PRNGKey(0)
    k1, k2, k3 = jax.random.split(key, 3)

    # Small NCHW-like input (128-aligned lane-dense fast path).
    x = jax.random.normal(k1, (2, 4, 16, 16), dtype=jnp.float32)
    y = jax.block_until_ready(sine(x))
    y_ref = jnp.sin(30.0 * x)
    assert y.shape == x.shape and y.dtype == x.dtype
    assert float(jnp.max(jnp.abs(y - y_ref))) < 1e-5

    # Mid-size input: exercises the multi-step (>= 2 grid steps) tiling.
    x1 = jax.random.normal(k2, (8, 256, 256), dtype=jnp.float32)
    y1 = jax.block_until_ready(sine(x1))
    assert float(jnp.max(jnp.abs(y1 - jnp.sin(30.0 * x1)))) < 1e-5

    # Ragged size (not a multiple of 128): pad/slice-free full-extent lane block.
    x2 = jax.random.normal(k3, (3, 5, 7), dtype=jnp.float32)
    y2 = jax.block_until_ready(sine(x2))
    y2_ref = jnp.sin(30.0 * x2)
    assert y2.shape == x2.shape and y2.dtype == x2.dtype
    assert float(jnp.max(jnp.abs(y2 - y2_ref))) < 1e-5

    # Integer input promotes to float32 (matches torch.sin semantics).
    xi = jnp.arange(128, dtype=jnp.int32).reshape(4, 32)
    yi = jax.block_until_ready(sine(xi))
    assert yi.dtype == jnp.float32 and yi.shape == xi.shape
    assert float(jnp.max(jnp.abs(yi - jnp.sin(30.0 * xi.astype(jnp.float32))))) < 1e-4

    print("KERNEL_OK")
</pallas_src>

<mosaic_0001>
module attributes {stable_mosaic.version = 11 : i64} {
  func.func @_sine_kernel(%arg0: i32, %arg1: memref<1x2048xf32, #tpu.memory_space<vmem>>, %arg2: memref<1x2048xf32, #tpu.memory_space<vmem>>) attributes {dimension_semantics = [#tpu.dimension_semantics<parallel>], iteration_bounds = array<i64: 1>, scalar_prefetch = 0 : i64, scratch_operands = 0 : i64, tpu.core_type = #tpu.core_type<tc>, window_params = [{transform_indices = @transform_0, window_bounds = array<i64: 1, 2048>}, {transform_indices = @transform_1, window_bounds = array<i64: 1, 2048>}]} {
    %c0 = arith.constant 0 : index
    %c0_0 = arith.constant 0 : index
    %0 = vector.load %arg1[%c0, %c0_0] : memref<1x2048xf32, #tpu.memory_space<vmem>>, vector<1x2048xf32>
    %cst = arith.constant 3.000000e+01 : f32
    %1 = vector.broadcast %cst : f32 to vector<1x2048xf32>
    %2 = arith.mulf %1, %0 : vector<1x2048xf32>
    %3 = math.sin %2 : vector<1x2048xf32>
    %c0_1 = arith.constant 0 : index
    %c0_2 = arith.constant 0 : index
    %4 = vector.load %arg2[%c0_1, %c0_2] : memref<1x2048xf32, #tpu.memory_space<vmem>>, vector<1x2048xf32>
    tpu.vector_store %arg2[%c0_1, %c0_2], %3 {strides = array<i32>} : memref<1x2048xf32, #tpu.memory_space<vmem>>, vector<1x2048xf32>,
    return
  }
  func.func @transform_0(%arg0: i32) -> (i32, i32) {
    %c0_i32 = arith.constant 0 : i32
    %c0_i32_0 = arith.constant 0 : i32
    return %arg0, %c0_i32 : i32, i32
  }
  func.func @transform_1(%arg0: i32) -> (i32, i32) {
    %c0_i32 = arith.constant 0 : i32
    %c0_i32_0 = arith.constant 0 : i32
    return %arg0, %c0_i32 : i32, i32
  }
}

</mosaic_0001>

<bundles_post_ra>
// kernel: tpu_custom_call.1
= control target key start
LH: loop header
LB: loop body
LE: loop exit
PB: predicated region body
PF: predicated region fallthrough
CT: control target
= control target key end

     0   :  { %6 = vsyncpa [#allocation3], 0  ;;  %s428_s0 = inlined_call_operand.hbm [shape: f32[1,2048], index: 0, kind: input, shape index: {}]   ;;  %s429_s1 = inlined_call_operand.hbm [shape: f32[1,2048], index: 1, kind: output, shape index: {}]  }
   0x1   :  { %7 = vsyncpa [#allocation4], 0  ;;  %s326_s6 = smov [#allocation2]  }
   0x2   :  { %s14_s7 = sshll.u32 %s326_s6, 4  ;;  %s15_s7 = int_to_ptr.vmem [resolvable:$true] %s14_s7 }
   0x3   :  { %s290_s8 = scalar_lea.vmem %s15_s7, 256  ;;  %p295_p1 = scmp.lt.s32.totalorder %s15_s7, %s15_s7 }
   0x4   :  { %p291_p0 = scmp.ne.s32.totalorder %s15_s7, %s290_s8  ;;  %p296_p2 = scmp.lt.s32.totalorder %s290_s8, %s290_s8 }
   0x6   :  { %p297_p3 = por %p296_p2, %p295_p1 }
   0x8   :  { %p298_p4 = pnand %p297_p3, %p291_p0 }
   0xa   :  { %301 = shalt.err (!%p298_p4)
}
   0xb   :  { %17 = dma.hbm_to_vmem [thread:$0]  %s428_s0, 256, %s15_s7, [#allocation3]  }
   0xc   :  { %322 = dma.done.wait [#allocation3], 256  }
   0xd   :  { %323 = vsyncadd [#allocation3], 4294967040  ;;  %v21_v0 = vld [vmem:[#allocation2] sm:$0xff]  ;;  %v22_v1 = vld [vmem:[#allocation2 + $0x8] sm:$0xff]  ;;  %v327_v26 = vmov 683565275  }
   0xe   :  { %v347_v2 = vmul.f32 30.0, %v21_v0  ;;  %v349_v3 = vmul.f32 30.0, %v22_v1  ;;  %v328_v28 = vmov 2475754826   ;;  %v329_v30 = vmov 2131351028  }
   0xf   :  { %v330_v32 = vmov 2102212464   ;;  %v331_v34 = vmov 920167782   ;;  %v332_v42 = vmov 1326507024  }
  0x10   :  { %v25_v4 = vand.u32 2147483647, %v347_v2  ;;  %v28_v5 = vand.u32 2139095040, %v347_v2  ;;  %v129_v6 = vand.u32 2147483647, %v349_v3  ;;  %v132_v7 = vand.u32 2139095040, %v349_v3 }
  0x11   :  { %vm27_vm14 = vcmp.lt.s32.totalorder %v347_v2, 0  ;;  %s333_s0 = smov [#allocation5]  }
  0x12   :  { %v29_v8 = vshrl.u32 %v28_v5, 23  ;;  %v32_v9 = vand.u32 8388607, %v25_v4  ;;  %v133_v10 = vshrl.u32 %v132_v7, 23  ;;  %v136_v11 = vand.u32 8388607, %v129_v6 }
  0x13   :  { %vm410_vm15 = vcmp.le.f32.partialorder %v25_v4, 0.7853982  ;;  %s241_s11 = sshll.u32 %s333_s0, 4  ;;  %s242_s11 = int_to_ptr.vmem [resolvable:$true] %s241_s11 }
  0x14   :  { %v250_v12 = vadd.s32 4294967169, %v29_v8  ;;  %v254_v13 = vadd.s32 4294967169, %v133_v10  ;;  %v33_v15 = vor.u32 8388608, %v32_v9  ;;  %v137_v16 = vor.u32 8388608, %v136_v11  ;;  %s302_s12 = scalar_lea.vmem %s242_s11, 256  ;;  %p307_p6 = scmp.lt.s32.totalorder %s242_s11, %s242_s11 }
  0x15   :  { %p303_p5 = scmp.ne.s32.totalorder %s242_s11, %s302_s12  ;;  %p308_p7 = scmp.lt.s32.totalorder %s302_s12, %s302_s12 }
  0x16   :  { %v35_v14 = vadd.s32 1, %v250_v12  ;;  %v139_v17 = vadd.s32 1, %v254_v13  ;;  %v359_v22 = vshll.u32 %v33_v15, 8  ;;  %v361_v24 = vshll.u32 %v137_v16, 8 }
  0x17   :  { %p309_p8 = por %p308_p7, %p307_p6 }
  0x18   :  { %vm36_vm0 = vcmp.gt.s32.totalorder %v35_v14, 0  ;;  %vm140_vm1 = vcmp.gt.s32.totalorder %v139_v17, 0 }
  0x19   :  { %v37_v18 = vsel %vm36_vm0, %v35_v14, 0  ;;  %v141_v21 = vsel %vm140_vm1, %v139_v17, 0  ;;  %vm131_vm0 = vcmp.lt.s32.totalorder %v349_v3, 0  ;;  %vm130_vm1 = vcmp.le.f32.partialorder %v129_v6, 0.7853982  ;;  %p310_p9 = pnand %p309_p8, %p303_p5 }
  0x1a   :  { %v38_v19 = vshrl.u32 %v37_v18, 5  ;;  %v39_v20 = vand.u32 31, %v37_v18  ;;  %v143_v23 = vand.u32 31, %v141_v21  ;;  %v363_v36 = vshrl.u32 %v141_v21, 5 }
  0x1c   :  { %v40_v25 = vsub.s32 32, %v39_v20  ;;  %v42_v27 = vshll.u32 %v327_v26, %v39_v20  ;;  %v45_v29 = vshll.u32 %v328_v28, %v39_v20  ;;  %v48_v31 = vshll.u32 %v329_v30, %v39_v20 }
  0x1d   :  { %v51_v33 = vshll.u32 %v330_v32, %v39_v20  ;;  %v54_v35 = vshll.u32 %v331_v34, %v39_v20  ;;  %vm57_vm2 = vcmp.lt.s32.totalorder %v38_v19, 1  ;;  %vm58_vm3 = vcmp.lt.s32.totalorder %v38_v19, 2 }
  0x1e   :  { %v41_v37 = vshrl.u32 %v327_v26, %v40_v25  ;;  %v43_v38 = vshrl.u32 %v328_v28, %v40_v25  ;;  %v46_v39 = vshrl.u32 %v329_v30, %v40_v25  ;;  %v49_v40 = vshrl.u32 %v330_v32, %v40_v25 }
  0x1f   :  { %v52_v41 = vshrl.u32 %v331_v34, %v40_v25  ;;  %v55_v43 = vshrl.u32 %v332_v42, %v40_v25  ;;  %vm60_vm4 = vcmp.lt.s32.totalorder %v38_v19, 4  ;;  %v144_v47 = vsub.s32 32, %v143_v23 }
  0x20   :  { %v44_v44 = vor.u32 %v43_v38, %v42_v27  ;;  %v47_v45 = vor.u32 %v46_v39, %v45_v29  ;;  %v50_v46 = vor.u32 %v49_v40, %v48_v31  ;;  %vm59_vm5 = vcmp.lt.s32.totalorder %v38_v19, 3 }
  0x21   :  { %v53_v48 = vor.u32 %v52_v41, %v51_v33  ;;  %v56_v49 = vor.u32 %v55_v43, %v54_v35  ;;  %v146_v50 = vshll.u32 %v327_v26, %v143_v23  ;;  %v149_v58 = vshll.u32 %v328_v28, %v143_v23 }
  0x22   :  { %v61_v51 = vsel %vm57_vm2, %v41_v37, %v44_v44  ;;  %v62_v52 = vsel %vm60_vm4, %v50_v46, 2102212464  ;;  %v65_v53 = vsel %vm57_vm2, %v44_v44, %v47_v45  ;;  %v69_v54 = vsel %vm57_vm2, %v47_v45, %v50_v46 }
  0x23   :  { %v63_v55 = vsel %vm59_vm5, %v47_v45, %v62_v52  ;;  %v66_v56 = vsel %vm60_vm4, %v53_v48, 920167782  ;;  %v70_v57 = vsel %vm60_vm4, %v56_v49, 1326507024  ;;  %v145_v61 = vshrl.u32 %v327_v26, %v144_v47 }
  0x24   :  { %v67_v59 = vsel %vm59_vm5, %v50_v46, %v66_v56  ;;  %v71_v60 = vsel %vm59_vm5, %v53_v48, %v70_v57  ;;  %v147_v62 = vshrl.u32 %v328_v28, %v144_v47  ;;  %v64_v63 = vsel %vm58_vm3, %v61_v51, %v63_v55 }
  0x25   :  { %v68_v0 = vsel %vm58_vm3, %v65_v53, %v67_v59  ;;  %v72_v1 = vsel %vm58_vm3, %v69_v54, %v71_v60  ;;  %v150_v5 = vshrl.u32 %v329_v30, %v144_v47  ;;  %v152_v13 = vshll.u32 %v329_v30, %v143_v23 }
  0x26   :  { %v372_v7 = vmul.u32.u64.low %v359_v22, %v72_v1  ;;  %v373_v8 = vmul.u32.u64.high %v359_v22, %v72_v1, %v372_v7  ;;  %v376_v9 = vmul.u32.u64.low %v359_v22, %v68_v0  ;;  %v377_v10 = vmul.u32.u64.high %v359_v22, %v68_v0, %v376_v9 }
  0x27   :  { %v148_v11 = vor.u32 %v147_v62, %v146_v50  ;;  %v151_v12 = vor.u32 %v150_v5, %v149_v58  ;;  %v153_v14 = vshrl.u32 %v330_v32, %v144_v47  ;;  %v155_v15 = vshll.u32 %v330_v32, %v143_v23 }
  0x28   :  { %v156_v16 = vshrl.u32 %v331_v34, %v144_v47  ;;  %v158_v17 = vshll.u32 %v331_v34, %v143_v23  ;;  %v159_v18 = vshrl.u32 %v332_v42, %v144_v47  ;;  %v80_v19 = vmul.u32 %v359_v22, %v64_v63 }
  0x29   :  { %v154_v20 = vor.u32 %v153_v14, %v152_v13  ;;  %vm161_vm6 = vcmp.lt.s32.totalorder %v363_v36, 1  ;;  %vm162_vm7 = vcmp.lt.s32.totalorder %v363_v36, 2  ;;  %vm82_vm8 = vc.u32 %v373_v8, %v376_v9 }
  0x2a   :  { %v83_v21 = vadd.s32 1, %v377_v10  ;;  %v157_v25 = vor.u32 %v156_v16, %v155_v15  ;;  %vm163_vm9 = vcmp.lt.s32.totalorder %v363_v36, 3  ;;  %v160_v26 = vor.u32 %v159_v18, %v158_v17 }
  0x2b   :  { %vm164_vm10 = vcmp.lt.s32.totalorder %v363_v36, 4  ;;  %v165_v27 = vsel %vm161_vm6, %v145_v61, %v148_v11  ;;  %v169_v23 = vsel %vm161_vm6, %v148_v11, %v151_v12  ;;  %v173_v30 = vsel %vm161_vm6, %v151_v12, %v154_v20 }
  0x2c   :  { %v84_v28 = vsel %vm82_vm8, %v83_v21, %v377_v10  ;;  %v166_v22 = vsel %vm164_vm10, %v154_v20, 2102212464  ;;  %v170_v29 = vsel %vm164_vm10, %v157_v25, 920167782  ;;  %v174_v34 = vsel %vm164_vm10, %v160_v26, 1326507024 }
  0x2d   :  { %v85_v31 = vadd.s32 %v84_v28, %v80_v19  ;;  %v167_v32 = vsel %vm163_vm9, %v151_v12, %v166_v22  ;;  %v171_v33 = vsel %vm163_vm9, %v154_v20, %v170_v29  ;;  %v175_v38 = vsel %vm163_vm9, %v157_v25, %v174_v34 }
  0x2e   :  { %v168_v35 = vsel %vm162_vm7, %v165_v27, %v167_v32  ;;  %v172_v37 = vsel %vm162_vm7, %v169_v23, %v171_v33  ;;  %v176_v40 = vsel %vm162_vm7, %v173_v30, %v175_v38  ;;  %v81_v59 = vadd.s32 %v376_v9, %v373_v8 }
  0x2f   :  { %v86_v39 = vadd.s32 536870912, %v85_v31  ;;  %v394_v41 = vmul.u32.u64.low %v361_v24, %v172_v37  ;;  %v395_v42 = vmul.u32.u64.high %v361_v24, %v172_v37, %v394_v41  ;;  %v184_v46 = vmul.u32 %v361_v24, %v168_v35 }
  0x30   :  { %v398_v43 = vmul.u32.u64.low %v361_v24, %v176_v40  ;;  %v399_v44 = vmul.u32.u64.high %v361_v24, %v176_v40, %v398_v43  ;;  %vm117_vm5 = vweird.f32 %v347_v2  ;;  %vm221_vm9 = vweird.f32 %v349_v3 }
  0x31   :  { %v87_v45 = vshrl.u32 %v86_v39, 30  ;;  %v187_v48 = vadd.s32 1, %v395_v42 }
  0x32   :  { %vm186_vm11 = vc.u32 %v399_v44, %v394_v41  ;;  %v185_v15 = vadd.s32 %v394_v41, %v399_v44 }
  0x33   :  { %v88_v47 = vshll.u32 %v87_v45, 30  ;;  %v188_v36 = vsel %vm186_vm11, %v187_v48, %v395_v42  ;;  %v111_v20 = vsub.s32 4, %v87_v45 }
  0x34   :  { %v189_v50 = vadd.s32 %v188_v36, %v184_v46 }
  0x35   :  { %v89_v49 = vsub.s32 %v85_v31, %v88_v47  ;;  %v112_v29 = vsel %vm27_vm14, %v111_v20, %v87_v45 }
  0x36   :  { %v190_v52 = vadd.s32 536870912, %v189_v50  ;;  %v114_v4 = vsel %vm410_vm15, 0, %v112_v29 }
  0x37   :  { %v91_v51 = vsub.s32 0, %v89_v49  ;;  %v118_v37 = vadd.s32 3, %v114_v4 }
  0x38   :  { %v191_v54 = vshrl.u32 %v190_v52, 30 }
  0x39   :  { %v251_v53 = vmin.u32 %v91_v51, %v89_v49  ;;  %v119_v42 = vand.u32 3, %v118_v37 }
  0x3a   :  { %v192_v56 = vshll.u32 %v191_v54, 30  ;;  %v215_v35 = vsub.s32 4, %v191_v54 }
  0x3b   :  { %v93_v55 = vclz %v251_v53  ;;  %vm124_vm2 = vcmp.eq.s32.totalorder %v119_v42, 2  ;;  %vm121_vm3 = vcmp.eq.s32.totalorder %v119_v42, 0  ;;  %vm120_vm4 = vcmp.lt.s32.totalorder %v119_v42, 2 }
  0x3c   :  { %v193_v58 = vsub.s32 %v189_v50, %v192_v56  ;;  %v216_v40 = vsel %vm131_vm0, %v215_v35, %v191_v54 }
  0x3d   :  { %v252_v57 = vadd.s32 4294967294, %v93_v55  ;;  %v218_v43 = vsel %vm130_vm1, 0, %v216_v40 }
  0x3e   :  { %v195_v60 = vsub.s32 0, %v193_v58  ;;  %v222_v47 = vadd.s32 3, %v218_v43 }
  0x3f   :  { %vm253_vm12 = vcmp.lt.s32.totalorder %v252_v57, 0 }
  0x40   :  { %v96_v24 = vsel %vm253_vm12, 0, %v252_v57  ;;  %v255_v0 = vmin.u32 %v195_v60, %v193_v58  ;;  %v223_v50 = vand.u32 3, %v222_v47 }
  0x41   :  { %v97_v61 = vsub.s32 32, %v96_v24  ;;  %v98_v62 = vshll.u32 %v89_v49, %v96_v24  ;;  %v101_v63 = vsub.s32 4294967266, %v96_v24 }
  0x42   :  { %v197_v7 = vclz %v255_v0  ;;  %vm228_vm6 = vcmp.eq.s32.totalorder %v223_v50, 2  ;;  %vm225_vm7 = vcmp.eq.s32.totalorder %v223_v50, 0  ;;  %vm224_vm8 = vcmp.lt.s32.totalorder %v223_v50, 2 }
  0x43   :  { %v99_v1 = vshrl.u32 %v81_v59, %v97_v61  ;;  %v102_v5 = vadd.s32 127, %v101_v63 }
  0x44   :  { %v256_v12 = vadd.s32 4294967294, %v197_v7 }
  0x45   :  { %v100_v10 = vor.u32 %v99_v1, %v98_v62  ;;  %v103_v11 = vshll.u32 %v102_v5, 23 }
  0x46   :  { %vm257_vm13 = vcmp.lt.s32.totalorder %v256_v12, 0 }
  0x47   :  { %v104_v13 = vor.u32 4788187, %v103_v11  ;;  %v107_v14 = vcvt.s32.f32 %v100_v10  ;;  %v200_v8 = vsel %vm257_vm13, 0, %v256_v12 }
  0x48   :  { %v201_v9 = vsub.s32 32, %v200_v8  ;;  %v202_v17 = vshll.u32 %v193_v58, %v200_v8  ;;  %v205_v18 = vsub.s32 4294967266, %v200_v8 }
  0x49   :  { %v105_v16 = vand.u32 2147483647, %v104_v13 }
  0x4a   :  { %v203_v21 = vshrl.u32 %v185_v15, %v201_v9  ;;  %v206_v25 = vadd.s32 127, %v205_v18 }
  0x4b   :  { %v108_v19 = vmul.f32 %v107_v14, %v105_v16 }
  0x4c   :  { %v204_v23 = vor.u32 %v203_v21, %v202_v17  ;;  %v207_v28 = vshll.u32 %v206_v25, 23 }
  0x4d   :  { %v109_v27 = vxor.u32 2147483648, %v108_v19 }
  0x4e   :  { %v208_v31 = vor.u32 4788187, %v207_v28  ;;  %v211_v32 = vcvt.s32.f32 %v204_v23 }
  0x4f   :  { %v110_v22 = vsel %vm27_vm14, %v109_v27, %v108_v19 }
  0x50   :  { %v113_v30 = vsel %vm410_vm15, %v347_v2, %v110_v22  ;;  %v209_v33 = vand.u32 2147483647, %v208_v31 }
  0x51   :  { %274 = vcosq.f32 %v113_v30 }
  0x52   :  { %276 = vsinq.f32 %v113_v30  ;;  %v212_v34 = vmul.f32 %v211_v32, %v209_v33 }
  0x54   :  { %v213_v38 = vxor.u32 2147483648, %v212_v34 }
  0x56   :  { %v214_v39 = vsel %vm131_vm0, %v213_v38, %v212_v34 }
  0x57   :  { %v217_v41 = vsel %vm130_vm1, %v349_v3, %v214_v39 }
  0x58   :  { %278 = vcosq.f32 %v217_v41 }
  0x59   :  { %280 = vsinq.f32 %v217_v41 }
  0x5e   :  { %v275_v44 = vpop.eup %274 }
  0x5f   :  { %v277_v45 = vpop.eup %276  ;;  %v125_v46 = vxor.u32 2147483648, %v275_v44 }
  0x60   :  { %v122_v48 = vxor.u32 2147483648, %v277_v45 }
  0x61   :  { %v126_v6 = vsel %vm124_vm2, %v125_v46, %v277_v45 }
  0x62   :  { %v123_v49 = vsel %vm121_vm3, %v275_v44, %v122_v48 }
  0x63   :  { %v127_v36 = vsel %vm120_vm4, %v123_v49, %v126_v6 }
  0x64   :  { %v128_v51 = vsel %vm117_vm5, nan, %v127_v36 }
  0x65   :  { %233 = vst [vmem:[#allocation5] sm:$0xff] %v128_v51  ;;  %v279_v52 = vpop.eup %278 }
  0x66   :  { %v281_v53 = vpop.eup %280  ;;  %v229_v54 = vxor.u32 2147483648, %v279_v52 }
  0x67   :  { %v226_v55 = vxor.u32 2147483648, %v281_v53 }
  0x68   :  { %v230_v56 = vsel %vm228_vm6, %v229_v54, %v281_v53 }
  0x69   :  { %v227_v57 = vsel %vm225_vm7, %v279_v52, %v226_v55 }
  0x6a   :  { %v231_v2 = vsel %vm224_vm8, %v227_v57, %v230_v56 }
  0x6b   :  { %v232_v58 = vsel %vm221_vm9, nan, %v231_v2 }
  0x6c   :  { %234 = vst [vmem:[#allocation5 + $0x8] sm:$0xff] %v232_v58 }
  0x6d   :  { %313 = shalt.err (!%p310_p9)
}
  0x6e   :  { %244 = dma.vmem_to_hbm [thread:$0]  %s242_s11, 256, %s429_s1, [#allocation4]  }
  0x6f   :  { %324 = dma.done.wait [#allocation4], 256  }
  0x70   :  { %325 = vsyncadd [#allocation4], 4294967040 }
  0x71   :  { %248 = vsyncpa [#allocation3], 1 }
  0x72   :  { %249 = vsyncpa [#allocation4], 1 }

</bundles_post_ra>
